<compile_context>
chip_gen: v6e
topology: v6e:2x2x1
jax: 0.10.0
libtpu: 0.0.40
codegen_flags: <defaults>
</compile_context>

<pallas_src>
import jax
import jax.numpy as jnp
from jax import lax
from jax.experimental import pallas as pl
from jax.experimental.pallas import tpu as pltpu


def _to_time_major(x):
    """(tb, S, H) -> (S, tb, H); minor dim (H, lanes) stays put."""
    try:
        return pltpu.einshape("bsh->sbh", x)
    except Exception:
        return jnp.transpose(x, (1, 0, 2))


def _answer_pointer_kernel(seq_ref, mask_ref, w_ih_t_ref, w_hh_t_ref, bias_ref,
                           start_ref, end_ref, p_ref):
    tb, S, H = seq_ref.shape
    f32 = jnp.float32
    seq_dtype = seq_ref.dtype

    w_ih_t = w_ih_t_ref[...]          # (H, H) native dtype: x @ w_ih_t == x @ W_ih^T
    w_hh_t = w_hh_t_ref[...]          # (H, H) f32
    bias = bias_ref[...]              # (1, H) f32 == b_ih + b_hh

    # ---- Hoisted input projection, shared by both RNN passes -----------------
    # One tall (tb*S, H) x (H, H) MXU matmul; result written TIME-MAJOR (S, tb, H)
    # so the serial recurrence reads a contiguous (tb, H) slab per step.
    proj = jnp.dot(seq_ref[...].reshape(tb * S, H), w_ih_t,
                   preferred_element_type=f32) + bias                   # (tb*S, H)
    p_ref[...] = _to_time_major(proj.reshape(tb, S, H))                 # (S, tb, H)

    mask = mask_ref[...]                                 # (tb, S) f32
    neg = (1.0 - mask) * (-1e30)                         # additive softmax mask

    unroll = 8 if S % 8 == 0 else (4 if S % 4 == 0 else (2 if S % 2 == 0 else 1))

    def rnn_last_hidden(h0):
        # h_t = tanh(P_t + h_{t-1} @ W_hh^T); only the small (tb,H)x(H,H) matmul and the
        # tanh remain on the serial critical path (input projection precomputed above).
        def step(t, h):
            return jnp.tanh(p_ref[t] + jnp.dot(h, w_hh_t, preferred_element_type=f32))
        return lax.fori_loop(0, S, step, h0, unroll=unroll)

    def attend(q, need_ctx):
        # Batched MXU matmuls with a size-1 query dim (same pattern as flash attention).
        q3 = q[:, None, :].astype(seq_dtype)                             # (tb, 1, H)
        scores = jnp.einsum('bqh,bsh->bqs', q3, seq_ref[...],
                            preferred_element_type=f32)                  # (tb, 1, S)
        logits = scores[:, 0, :] + neg                                   # (tb, S)
        if not need_ctx:
            return logits, None
        m = jnp.max(logits, axis=-1, keepdims=True)
        e = jnp.exp(logits - m)
        dist = e / jnp.sum(e, axis=-1, keepdims=True)                    # (tb, S)
        ctx = jnp.einsum('bqs,bsh->bqh', dist[:, None, :].astype(seq_dtype),
                         seq_ref[...], preferred_element_type=f32)[:, 0, :]   # (tb, H)
        return logits, ctx

    h1 = rnn_last_hidden(jnp.zeros((tb, H), f32))
    start_logits, a_s = attend(h1, need_ctx=True)
    h2 = rnn_last_hidden(a_s)
    end_logits, _ = attend(h2, need_ctx=False)        # end-pointer context is dead work

    start_ref[...] = start_logits
    end_ref[...] = end_logits


def _plan_tiling(B, S, H, seq_itemsize):
    """Pick (batch_tile, vmem_limit_bytes) from the device's actual VMEM capacity."""
    try:
        vmem_cap = int(pltpu.get_tpu_info().vmem_capacity_bytes)
    except Exception:
        vmem_cap = 64 * 1024 * 1024            # v7x-conservative fallback
    budget = int(vmem_cap * 0.55)              # leave headroom for Mosaic internal scratch

    def est(tb):
        seq_tile = 2 * tb * S * H * seq_itemsize                   # double-buffered input tile
        small_io = (2 + 2 * 2) * tb * S * 4                        # mask + 2 outputs, dbl-buffered
        weights = 2 * (H * H * seq_itemsize + H * H * 4 + H * 4)   # replicated weight blocks
        proj = tb * S * H * 4                                       # time-major projection scratch
        temps = 2 * tb * S * H * 4 + 6 * tb * S * 4 + 4 * tb * H * 4
        return seq_tile + small_io + weights + proj + temps

    if B % 8 != 0:
        tb = B                                  # single full-batch block (block == array dims)
    else:
        cap = min(B, 256)
        if B >= 16:
            cap = min(cap, B // 2)              # keep >= 2 grid steps (v7x megacore, pipelining)
        cands = [t for t in range(8, cap + 1, 8) if B % t == 0 and est(t) <= budget]
        # tb = 8 is the smallest legal tile; vmem_limit below is sized from est(tb) so the
        # degenerate case degrades to a (possibly tight) explicit limit rather than a magic 48 MiB.
        tb = max(cands) if cands else 8

    vmem_limit = int(min(0.9 * vmem_cap, max(est(tb) + (8 << 20), 32 << 20)))
    return tb, vmem_limit


def answer_pointer_output(sequence_output, attention_mask, w_ih, w_hh, b_ih, b_hh):
    """sequence_output: (B, S, H) float; attention_mask: (B, S) {0,1}.
    Returns logits: (B, S, 2) float32."""
    B, S, H = sequence_output.shape
    seq = sequence_output                                    # DMA'd in native dtype (no upcast)
    mask = attention_mask.astype(jnp.float32)
    # W_ih^T in the activation dtype so the big projection matmul runs with native (e.g. bf16)
    # MXU operands; the recurrence weight stays f32 (serial critical-path numerics).
    w_ih_t = jnp.asarray(w_ih).T.astype(seq.dtype)
    w_hh_t = jnp.asarray(w_hh).astype(jnp.float32).T
    bias = (jnp.asarray(b_ih, jnp.float32)
            + jnp.asarray(b_hh, jnp.float32)).reshape(1, H)

    tb, vmem_limit = _plan_tiling(B, S, H, jnp.dtype(seq.dtype).itemsize)
    grid = (B // tb,)

    start, end = pl.pallas_call(
        _answer_pointer_kernel,
        out_shape=(jax.ShapeDtypeStruct((B, S), jnp.float32),
                   jax.ShapeDtypeStruct((B, S), jnp.float32)),
        grid=grid,
        in_specs=[
            pl.BlockSpec((tb, S, H), lambda i: (i, 0, 0)),   # sequence_output (batch-first)
            pl.BlockSpec((tb, S), lambda i: (i, 0)),         # mask
            pl.BlockSpec((H, H), lambda i: (0, 0)),          # W_ih^T (replicated)
            pl.BlockSpec((H, H), lambda i: (0, 0)),          # W_hh^T (replicated)
            pl.BlockSpec((1, H), lambda i: (0, 0)),          # b_ih + b_hh
        ],
        out_specs=(pl.BlockSpec((tb, S), lambda i: (i, 0)),
                   pl.BlockSpec((tb, S), lambda i: (i, 0))),
        scratch_shapes=[pltpu.VMEM((S, tb, H), jnp.float32)],    # time-major projection P
        compiler_params=pltpu.CompilerParams(
            dimension_semantics=("parallel",),
            vmem_limit_bytes=vmem_limit),
    )(seq, mask, w_ih_t, w_hh_t, bias)

    return jnp.stack([start, end], axis=-1)                  # (B, S, 2)


def _reference(sequence_output, attention_mask, w_ih, w_hh, b_ih, b_hh):
    """Pure-JAX reference of the same forward pass (for correctness check)."""
    seq = sequence_output.astype(jnp.float32)
    neg = (1.0 - attention_mask.astype(jnp.float32)) * (-1e30)

    def rnn_last(h0):
        def step(h, x_t):
            h = jnp.tanh(x_t @ w_ih.T + b_ih + h @ w_hh.T + b_hh)
            return h, None
        h, _ = lax.scan(step, h0, jnp.transpose(seq, (1, 0, 2)))
        return h

    def attend(q):
        logits = jnp.einsum('bh,bsh->bs', q, seq) + neg
        dist = jax.nn.softmax(logits, axis=-1)
        out = jnp.einsum('bs,bsh->bh', dist, seq)
        return logits, out

    B, S, H = seq.shape
    h1 = rnn_last(jnp.zeros((B, H), jnp.float32))
    sl, a_s = attend(h1)
    h2 = rnn_last(a_s)
    el, _ = attend(h2)
    return jnp.stack([sl, el], axis=-1)


if __name__ == "__main__":
    B, S, H = 2, 8, 32
    key = jax.random.PRNGKey(0)
    k_seq, k_wih, k_whh, k_bih, k_bhh = jax.random.split(key, 5)

    sequence_output = jax.random.normal(k_seq, (B, S, H), dtype=jnp.float32)
    attention_mask = jnp.ones((B, S), dtype=jnp.float32).at[1, 6:].set(0.0)

    # nn.RNN default init: U(-1/sqrt(H), 1/sqrt(H)) for all weights and biases.
    bound = 1.0 / (H ** 0.5)
    w_ih = jax.random.uniform(k_wih, (H, H), jnp.float32, -bound, bound)
    w_hh = jax.random.uniform(k_whh, (H, H), jnp.float32, -bound, bound)
    b_ih = jax.random.uniform(k_bih, (H,), jnp.float32, -bound, bound)
    b_hh = jax.random.uniform(k_bhh, (H,), jnp.float32, -bound, bound)

    logits = answer_pointer_output(sequence_output, attention_mask,
                                   w_ih, w_hh, b_ih, b_hh)
    logits = jax.block_until_ready(logits)
    assert logits.shape == (B, S, 2)

    ref = _reference(sequence_output, attention_mask, w_ih, w_hh, b_ih, b_hh)
    assert jnp.allclose(logits, ref, rtol=1e-4, atol=1e-4), "mismatch vs JAX reference"

    print("KERNEL_OK")
</pallas_src>

<mosaic_0001>
module attributes {stable_mosaic.version = 11 : i64} {
  func.func @_answer_pointer_kernel(%arg0: i32, %arg1: memref<2x8x32xf32, #tpu.memory_space<vmem>>, %arg2: memref<2x8xf32, #tpu.memory_space<vmem>>, %arg3: memref<32x32xf32, #tpu.memory_space<vmem>>, %arg4: memref<32x32xf32, #tpu.memory_space<vmem>>, %arg5: memref<1x32xf32, #tpu.memory_space<vmem>>, %arg6: memref<2x8xf32, #tpu.memory_space<vmem>>, %arg7: memref<2x8xf32, #tpu.memory_space<vmem>>, %arg8: memref<8x2x32xf32, #tpu.memory_space<vmem>>) attributes {dimension_semantics = [#tpu.dimension_semantics<parallel>], iteration_bounds = array<i64: 1>, scalar_prefetch = 0 : i64, scratch_operands = 1 : i64, tpu.core_type = #tpu.core_type<tc>, window_params = [{transform_indices = @transform_0, window_bounds = array<i64: 2, 8, 32>}, {transform_indices = @transform_1, window_bounds = array<i64: 2, 8>}, {pipeline_mode = #tpu.pipeline_mode<synchronous>, transform_indices = @transform_2, window_bounds = array<i64: 32, 32>}, {pipeline_mode = #tpu.pipeline_mode<synchronous>, transform_indices = @transform_3, window_bounds = array<i64: 32, 32>}, {pipeline_mode = #tpu.pipeline_mode<synchronous>, transform_indices = @transform_4, window_bounds = array<i64: 1, 32>}, {transform_indices = @transform_5, window_bounds = array<i64: 2, 8>}, {transform_indices = @transform_6, window_bounds = array<i64: 2, 8>}]} {
    %c0 = arith.constant 0 : index
    %c0_0 = arith.constant 0 : index
    %0 = vector.load %arg3[%c0, %c0_0] : memref<32x32xf32, #tpu.memory_space<vmem>>, vector<32x32xf32>
    %c0_1 = arith.constant 0 : index
    %c0_2 = arith.constant 0 : index
    %1 = vector.load %arg4[%c0_1, %c0_2] : memref<32x32xf32, #tpu.memory_space<vmem>>, vector<32x32xf32>
    %c0_3 = arith.constant 0 : index
    %c0_4 = arith.constant 0 : index
    %2 = vector.load %arg5[%c0_3, %c0_4] : memref<1x32xf32, #tpu.memory_space<vmem>>, vector<1x32xf32>
    %c0_5 = arith.constant 0 : index
    %c0_6 = arith.constant 0 : index
    %c0_7 = arith.constant 0 : index
    %3 = vector.load %arg1[%c0_5, %c0_6, %c0_7] : memref<2x8x32xf32, #tpu.memory_space<vmem>>, vector<2x8x32xf32>
    %4 = vector.shape_cast %3 : vector<2x8x32xf32> to vector<16x32xf32>
    %cst = arith.constant dense<0.000000e+00> : vector<16x32xf32>
    %5 = tpu.matmul %4, %0, %cst {dimension_numbers = #tpu.dot_dimension_numbers<[1], [0], [0], [1], [0, 0, 1, 1], [], []>} : vector<16x32xf32>, vector<32x32xf32>, vector<16x32xf32> -> vector<16x32xf32>
    %6 = vector.broadcast %2 : vector<1x32xf32> to vector<16x32xf32>
    %7 = arith.addf %5, %6 : vector<16x32xf32>
    %8 = vector.shape_cast %7 : vector<16x32xf32> to vector<2x8x32xf32>
    %9 = tpu.transpose %8, [1, 0, 2] : vector<2x8x32xf32> -> vector<8x2x32xf32>
    %c0_8 = arith.constant 0 : index
    %c0_9 = arith.constant 0 : index
    %c0_10 = arith.constant 0 : index
    %10 = vector.load %arg8[%c0_8, %c0_9, %c0_10] : memref<8x2x32xf32, #tpu.memory_space<vmem>>, vector<8x2x32xf32>
    tpu.vector_store %arg8[%c0_8, %c0_9, %c0_10], %9 {strides = array<i32>} : memref<8x2x32xf32, #tpu.memory_space<vmem>>, vector<8x2x32xf32>,
    %c0_11 = arith.constant 0 : index
    %c0_12 = arith.constant 0 : index
    %11 = vector.load %arg2[%c0_11, %c0_12] : memref<2x8xf32, #tpu.memory_space<vmem>>, vector<2x8xf32>
    %cst_13 = arith.constant 1.000000e+00 : f32
    %12 = vector.broadcast %cst_13 : f32 to vector<2x8xf32>
    %13 = arith.subf %12, %11 : vector<2x8xf32>
    %cst_14 = arith.constant -1.000000e+30 : f32
    %14 = vector.broadcast %cst_14 : f32 to vector<2x8xf32>
    %15 = arith.mulf %13, %14 : vector<2x8xf32>
    %cst_15 = arith.constant 0.000000e+00 : f32
    %16 = vector.broadcast %cst_15 : f32 to vector<2x32xf32>
    %c0_i32 = arith.constant 0 : i32
    %17 = arith.index_cast %c0_i32 : i32 to index
    %c0_16 = arith.constant 0 : index
    %c0_17 = arith.constant 0 : index
    %18 = vector.load %arg8[%17, %c0_16, %c0_17] : memref<8x2x32xf32, #tpu.memory_space<vmem>>, vector<1x2x32xf32>
    %19 = vector.shape_cast %18 : vector<1x2x32xf32> to vector<2x32xf32>
    %cst_18 = arith.constant dense<0.000000e+00> : vector<2x32xf32>
    %20 = tpu.matmul %16, %1, %cst_18 {dimension_numbers = #tpu.dot_dimension_numbers<[1], [0], [0], [1], [0, 0, 1, 1], [], []>} : vector<2x32xf32>, vector<32x32xf32>, vector<2x32xf32> -> vector<2x32xf32>
    %21 = arith.addf %19, %20 : vector<2x32xf32>
    %22 = math.tanh %21 : vector<2x32xf32>
    %c1_i32 = arith.constant 1 : i32
    %23 = arith.index_cast %c1_i32 : i32 to index
    %c0_19 = arith.constant 0 : index
    %c0_20 = arith.constant 0 : index
    %24 = vector.load %arg8[%23, %c0_19, %c0_20] : memref<8x2x32xf32, #tpu.memory_space<vmem>>, vector<1x2x32xf32>
    %25 = vector.shape_cast %24 : vector<1x2x32xf32> to vector<2x32xf32>
    %cst_21 = arith.constant dense<0.000000e+00> : vector<2x32xf32>
    %26 = tpu.matmul %22, %1, %cst_21 {dimension_numbers = #tpu.dot_dimension_numbers<[1], [0], [0], [1], [0, 0, 1, 1], [], []>} : vector<2x32xf32>, vector<32x32xf32>, vector<2x32xf32> -> vector<2x32xf32>
    %27 = arith.addf %25, %26 : vector<2x32xf32>
    %28 = math.tanh %27 : vector<2x32xf32>
    %c2_i32 = arith.constant 2 : i32
    %29 = arith.index_cast %c2_i32 : i32 to index
    %c0_22 = arith.constant 0 : index
    %c0_23 = arith.constant 0 : index
    %30 = vector.load %arg8[%29, %c0_22, %c0_23] : memref<8x2x32xf32, #tpu.memory_space<vmem>>, vector<1x2x32xf32>
    %31 = vector.shape_cast %30 : vector<1x2x32xf32> to vector<2x32xf32>
    %cst_24 = arith.constant dense<0.000000e+00> : vector<2x32xf32>
    %32 = tpu.matmul %28, %1, %cst_24 {dimension_numbers = #tpu.dot_dimension_numbers<[1], [0], [0], [1], [0, 0, 1, 1], [], []>} : vector<2x32xf32>, vector<32x32xf32>, vector<2x32xf32> -> vector<2x32xf32>
    %33 = arith.addf %31, %32 : vector<2x32xf32>
    %34 = math.tanh %33 : vector<2x32xf32>
    %c3_i32 = arith.constant 3 : i32
    %35 = arith.index_cast %c3_i32 : i32 to index
    %c0_25 = arith.constant 0 : index
    %c0_26 = arith.constant 0 : index
    %36 = vector.load %arg8[%35, %c0_25, %c0_26] : memref<8x2x32xf32, #tpu.memory_space<vmem>>, vector<1x2x32xf32>
    %37 = vector.shape_cast %36 : vector<1x2x32xf32> to vector<2x32xf32>
    %cst_27 = arith.constant dense<0.000000e+00> : vector<2x32xf32>
    %38 = tpu.matmul %34, %1, %cst_27 {dimension_numbers = #tpu.dot_dimension_numbers<[1], [0], [0], [1], [0, 0, 1, 1], [], []>} : vector<2x32xf32>, vector<32x32xf32>, vector<2x32xf32> -> vector<2x32xf32>
    %39 = arith.addf %37, %38 : vector<2x32xf32>
    %40 = math.tanh %39 : vector<2x32xf32>
    %c4_i32 = arith.constant 4 : i32
    %41 = arith.index_cast %c4_i32 : i32 to index
    %c0_28 = arith.constant 0 : index
    %c0_29 = arith.constant 0 : index
    %42 = vector.load %arg8[%41, %c0_28, %c0_29] : memref<8x2x32xf32, #tpu.memory_space<vmem>>, vector<1x2x32xf32>
    %43 = vector.shape_cast %42 : vector<1x2x32xf32> to vector<2x32xf32>
    %cst_30 = arith.constant dense<0.000000e+00> : vector<2x32xf32>
    %44 = tpu.matmul %40, %1, %cst_30 {dimension_numbers = #tpu.dot_dimension_numbers<[1], [0], [0], [1], [0, 0, 1, 1], [], []>} : vector<2x32xf32>, vector<32x32xf32>, vector<2x32xf32> -> vector<2x32xf32>
    %45 = arith.addf %43, %44 : vector<2x32xf32>
    %46 = math.tanh %45 : vector<2x32xf32>
    %c5_i32 = arith.constant 5 : i32
    %47 = arith.index_cast %c5_i32 : i32 to index
    %c0_31 = arith.constant 0 : index
    %c0_32 = arith.constant 0 : index
    %48 = vector.load %arg8[%47, %c0_31, %c0_32] : memref<8x2x32xf32, #tpu.memory_space<vmem>>, vector<1x2x32xf32>
    %49 = vector.shape_cast %48 : vector<1x2x32xf32> to vector<2x32xf32>
    %cst_33 = arith.constant dense<0.000000e+00> : vector<2x32xf32>
    %50 = tpu.matmul %46, %1, %cst_33 {dimension_numbers = #tpu.dot_dimension_numbers<[1], [0], [0], [1], [0, 0, 1, 1], [], []>} : vector<2x32xf32>, vector<32x32xf32>, vector<2x32xf32> -> vector<2x32xf32>
    %51 = arith.addf %49, %50 : vector<2x32xf32>
    %52 = math.tanh %51 : vector<2x32xf32>
    %c6_i32 = arith.constant 6 : i32
    %53 = arith.index_cast %c6_i32 : i32 to index
    %c0_34 = arith.constant 0 : index
    %c0_35 = arith.constant 0 : index
    %54 = vector.load %arg8[%53, %c0_34, %c0_35] : memref<8x2x32xf32, #tpu.memory_space<vmem>>, vector<1x2x32xf32>
    %55 = vector.shape_cast %54 : vector<1x2x32xf32> to vector<2x32xf32>
    %cst_36 = arith.constant dense<0.000000e+00> : vector<2x32xf32>
    %56 = tpu.matmul %52, %1, %cst_36 {dimension_numbers = #tpu.dot_dimension_numbers<[1], [0], [0], [1], [0, 0, 1, 1], [], []>} : vector<2x32xf32>, vector<32x32xf32>, vector<2x32xf32> -> vector<2x32xf32>
    %57 = arith.addf %55, %56 : vector<2x32xf32>
    %58 = math.tanh %57 : vector<2x32xf32>
    %c7_i32 = arith.constant 7 : i32
    %59 = arith.index_cast %c7_i32 : i32 to index
    %c0_37 = arith.constant 0 : index
    %c0_38 = arith.constant 0 : index
    %60 = vector.load %arg8[%59, %c0_37, %c0_38] : memref<8x2x32xf32, #tpu.memory_space<vmem>>, vector<1x2x32xf32>
    %61 = vector.shape_cast %60 : vector<1x2x32xf32> to vector<2x32xf32>
    %cst_39 = arith.constant dense<0.000000e+00> : vector<2x32xf32>
    %62 = tpu.matmul %58, %1, %cst_39 {dimension_numbers = #tpu.dot_dimension_numbers<[1], [0], [0], [1], [0, 0, 1, 1], [], []>} : vector<2x32xf32>, vector<32x32xf32>, vector<2x32xf32> -> vector<2x32xf32>
    %63 = arith.addf %61, %62 : vector<2x32xf32>
    %64 = math.tanh %63 : vector<2x32xf32>
    %c8_i32 = arith.constant 8 : i32
    %65 = vector.shape_cast %64 : vector<2x32xf32> to vector<2x1x32xf32>
    %c0_40 = arith.constant 0 : index
    %c0_41 = arith.constant 0 : index
    %c0_42 = arith.constant 0 : index
    %66 = vector.load %arg1[%c0_40, %c0_41, %c0_42] : memref<2x8x32xf32, #tpu.memory_space<vmem>>, vector<2x8x32xf32>
    "tpu.trace_start"() <{level = 10 : i32, message = "bqh,bsh->bqs"}> : () -> ()
    %cst_43 = arith.constant dense<0.000000e+00> : vector<2x1x8xf32>
    %67 = tpu.matmul %65, %66, %cst_43 {dimension_numbers = #tpu.dot_dimension_numbers<[2], [2], [1], [1], [0, 0, 0, 1, 1, 1], [0], [0]>} : vector<2x1x32xf32>, vector<2x8x32xf32>, vector<2x1x8xf32> -> vector<2x1x8xf32>
    "tpu.trace_stop"() : () -> ()
    %68 = vector.shape_cast %67 : vector<2x1x8xf32> to vector<2x8xf32>
    %69 = arith.addf %68, %15 : vector<2x8xf32>
    %cst_44 = arith.constant dense<0xFF800000> : vector<2xf32>
    %70 = vector.multi_reduction <maximumf>, %69, %cst_44 [1] : vector<2x8xf32> to vector<2xf32>
    %71 = vector.shape_cast %70 : vector<2xf32> to vector<2x1xf32>
    %72 = vector.broadcast %71 : vector<2x1xf32> to vector<2x8xf32>
    %73 = arith.subf %69, %72 : vector<2x8xf32>
    %74 = math.exp %73 : vector<2x8xf32>
    %cst_45 = arith.constant dense<0.000000e+00> : vector<2xf32>
    %75 = vector.multi_reduction <add>, %74, %cst_45 [1] : vector<2x8xf32> to vector<2xf32>
    %76 = vector.shape_cast %75 : vector<2xf32> to vector<2x1xf32>
    %77 = vector.broadcast %76 : vector<2x1xf32> to vector<2x8xf32>
    %78 = arith.divf %74, %77 : vector<2x8xf32>
    %79 = vector.shape_cast %78 : vector<2x8xf32> to vector<2x1x8xf32>
    %c0_46 = arith.constant 0 : index
    %c0_47 = arith.constant 0 : index
    %c0_48 = arith.constant 0 : index
    %80 = vector.load %arg1[%c0_46, %c0_47, %c0_48] : memref<2x8x32xf32, #tpu.memory_space<vmem>>, vector<2x8x32xf32>
    "tpu.trace_start"() <{level = 10 : i32, message = "bqs,bsh->bqh"}> : () -> ()
    %cst_49 = arith.constant dense<0.000000e+00> : vector<2x1x32xf32>
    %81 = tpu.matmul %79, %80, %cst_49 {dimension_numbers = #tpu.dot_dimension_numbers<[2], [1], [1], [2], [0, 0, 0, 1, 1, 2], [0], [0]>} : vector<2x1x8xf32>, vector<2x8x32xf32>, vector<2x1x32xf32> -> vector<2x1x32xf32>
    "tpu.trace_stop"() : () -> ()
    %82 = vector.shape_cast %81 : vector<2x1x32xf32> to vector<2x32xf32>
    %c0_i32_50 = arith.constant 0 : i32
    %83 = arith.index_cast %c0_i32_50 : i32 to index
    %c0_51 = arith.constant 0 : index
    %c0_52 = arith.constant 0 : index
    %84 = vector.load %arg8[%83, %c0_51, %c0_52] : memref<8x2x32xf32, #tpu.memory_space<vmem>>, vector<1x2x32xf32>
    %85 = vector.shape_cast %84 : vector<1x2x32xf32> to vector<2x32xf32>
    %cst_53 = arith.constant dense<0.000000e+00> : vector<2x32xf32>
    %86 = tpu.matmul %82, %1, %cst_53 {dimension_numbers = #tpu.dot_dimension_numbers<[1], [0], [0], [1], [0, 0, 1, 1], [], []>} : vector<2x32xf32>, vector<32x32xf32>, vector<2x32xf32> -> vector<2x32xf32>
    %87 = arith.addf %85, %86 : vector<2x32xf32>
    %88 = math.tanh %87 : vector<2x32xf32>
    %c1_i32_54 = arith.constant 1 : i32
    %89 = arith.index_cast %c1_i32_54 : i32 to index
    %c0_55 = arith.constant 0 : index
    %c0_56 = arith.constant 0 : index
    %90 = vector.load %arg8[%89, %c0_55, %c0_56] : memref<8x2x32xf32, #tpu.memory_space<vmem>>, vector<1x2x32xf32>
    %91 = vector.shape_cast %90 : vector<1x2x32xf32> to vector<2x32xf32>
    %cst_57 = arith.constant dense<0.000000e+00> : vector<2x32xf32>
    %92 = tpu.matmul %88, %1, %cst_57 {dimension_numbers = #tpu.dot_dimension_numbers<[1], [0], [0], [1], [0, 0, 1, 1], [], []>} : vector<2x32xf32>, vector<32x32xf32>, vector<2x32xf32> -> vector<2x32xf32>
    %93 = arith.addf %91, %92 : vector<2x32xf32>
    %94 = math.tanh %93 : vector<2x32xf32>
    %c2_i32_58 = arith.constant 2 : i32
    %95 = arith.index_cast %c2_i32_58 : i32 to index
    %c0_59 = arith.constant 0 : index
    %c0_60 = arith.constant 0 : index
    %96 = vector.load %arg8[%95, %c0_59, %c0_60] : memref<8x2x32xf32, #tpu.memory_space<vmem>>, vector<1x2x32xf32>
    %97 = vector.shape_cast %96 : vector<1x2x32xf32> to vector<2x32xf32>
    %cst_61 = arith.constant dense<0.000000e+00> : vector<2x32xf32>
    %98 = tpu.matmul %94, %1, %cst_61 {dimension_numbers = #tpu.dot_dimension_numbers<[1], [0], [0], [1], [0, 0, 1, 1], [], []>} : vector<2x32xf32>, vector<32x32xf32>, vector<2x32xf32> -> vector<2x32xf32>
    %99 = arith.addf %97, %98 : vector<2x32xf32>
    %100 = math.tanh %99 : vector<2x32xf32>
    %c3_i32_62 = arith.constant 3 : i32
    %101 = arith.index_cast %c3_i32_62 : i32 to index
    %c0_63 = arith.constant 0 : index
    %c0_64 = arith.constant 0 : index
    %102 = vector.load %arg8[%101, %c0_63, %c0_64] : memref<8x2x32xf32, #tpu.memory_space<vmem>>, vector<1x2x32xf32>
    %103 = vector.shape_cast %102 : vector<1x2x32xf32> to vector<2x32xf32>
    %cst_65 = arith.constant dense<0.000000e+00> : vector<2x32xf32>
    %104 = tpu.matmul %100, %1, %cst_65 {dimension_numbers = #tpu.dot_dimension_numbers<[1], [0], [0], [1], [0, 0, 1, 1], [], []>} : vector<2x32xf32>, vector<32x32xf32>, vector<2x32xf32> -> vector<2x32xf32>
    %105 = arith.addf %103, %104 : vector<2x32xf32>
    %106 = math.tanh %105 : vector<2x32xf32>
    %c4_i32_66 = arith.constant 4 : i32
    %107 = arith.index_cast %c4_i32_66 : i32 to index
    %c0_67 = arith.constant 0 : index
    %c0_68 = arith.constant 0 : index
    %108 = vector.load %arg8[%107, %c0_67, %c0_68] : memref<8x2x32xf32, #tpu.memory_space<vmem>>, vector<1x2x32xf32>
    %109 = vector.shape_cast %108 : vector<1x2x32xf32> to vector<2x32xf32>
    %cst_69 = arith.constant dense<0.000000e+00> : vector<2x32xf32>
    %110 = tpu.matmul %106, %1, %cst_69 {dimension_numbers = #tpu.dot_dimension_numbers<[1], [0], [0], [1], [0, 0, 1, 1], [], []>} : vector<2x32xf32>, vector<32x32xf32>, vector<2x32xf32> -> vector<2x32xf32>
    %111 = arith.addf %109, %110 : vector<2x32xf32>
    %112 = math.tanh %111 : vector<2x32xf32>
    %c5_i32_70 = arith.constant 5 : i32
    %113 = arith.index_cast %c5_i32_70 : i32 to index
    %c0_71 = arith.constant 0 : index
    %c0_72 = arith.constant 0 : index
    %114 = vector.load %arg8[%113, %c0_71, %c0_72] : memref<8x2x32xf32, #tpu.memory_space<vmem>>, vector<1x2x32xf32>
    %115 = vector.shape_cast %114 : vector<1x2x32xf32> to vector<2x32xf32>
    %cst_73 = arith.constant dense<0.000000e+00> : vector<2x32xf32>
    %116 = tpu.matmul %112, %1, %cst_73 {dimension_numbers = #tpu.dot_dimension_numbers<[1], [0], [0], [1], [0, 0, 1, 1], [], []>} : vector<2x32xf32>, vector<32x32xf32>, vector<2x32xf32> -> vector<2x32xf32>
    %117 = arith.addf %115, %116 : vector<2x32xf32>
    %118 = math.tanh %117 : vector<2x32xf32>
    %c6_i32_74 = arith.constant 6 : i32
    %119 = arith.index_cast %c6_i32_74 : i32 to index
    %c0_75 = arith.constant 0 : index
    %c0_76 = arith.constant 0 : index
    %120 = vector.load %arg8[%119, %c0_75, %c0_76] : memref<8x2x32xf32, #tpu.memory_space<vmem>>, vector<1x2x32xf32>
    %121 = vector.shape_cast %120 : vector<1x2x32xf32> to vector<2x32xf32>
    %cst_77 = arith.constant dense<0.000000e+00> : vector<2x32xf32>
    %122 = tpu.matmul %118, %1, %cst_77 {dimension_numbers = #tpu.dot_dimension_numbers<[1], [0], [0], [1], [0, 0, 1, 1], [], []>} : vector<2x32xf32>, vector<32x32xf32>, vector<2x32xf32> -> vector<2x32xf32>
    %123 = arith.addf %121, %122 : vector<2x32xf32>
    %124 = math.tanh %123 : vector<2x32xf32>
    %c7_i32_78 = arith.constant 7 : i32
    %125 = arith.index_cast %c7_i32_78 : i32 to index
    %c0_79 = arith.constant 0 : index
    %c0_80 = arith.constant 0 : index
    %126 = vector.load %arg8[%125, %c0_79, %c0_80] : memref<8x2x32xf32, #tpu.memory_space<vmem>>, vector<1x2x32xf32>
    %127 = vector.shape_cast %126 : vector<1x2x32xf32> to vector<2x32xf32>
    %cst_81 = arith.constant dense<0.000000e+00> : vector<2x32xf32>
    %128 = tpu.matmul %124, %1, %cst_81 {dimension_numbers = #tpu.dot_dimension_numbers<[1], [0], [0], [1], [0, 0, 1, 1], [], []>} : vector<2x32xf32>, vector<32x32xf32>, vector<2x32xf32> -> vector<2x32xf32>
    %129 = arith.addf %127, %128 : vector<2x32xf32>
    %130 = math.tanh %129 : vector<2x32xf32>
    %c8_i32_82 = arith.constant 8 : i32
    %131 = vector.shape_cast %130 : vector<2x32xf32> to vector<2x1x32xf32>
    %c0_83 = arith.constant 0 : index
    %c0_84 = arith.constant 0 : index
    %c0_85 = arith.constant 0 : index
    %132 = vector.load %arg1[%c0_83, %c0_84, %c0_85] : memref<2x8x32xf32, #tpu.memory_space<vmem>>, vector<2x8x32xf32>
    "tpu.trace_start"() <{level = 10 : i32, message = "bqh,bsh->bqs"}> : () -> ()
    %cst_86 = arith.constant dense<0.000000e+00> : vector<2x1x8xf32>
    %133 = tpu.matmul %131, %132, %cst_86 {dimension_numbers = #tpu.dot_dimension_numbers<[2], [2], [1], [1], [0, 0, 0, 1, 1, 1], [0], [0]>} : vector<2x1x32xf32>, vector<2x8x32xf32>, vector<2x1x8xf32> -> vector<2x1x8xf32>
    "tpu.trace_stop"() : () -> ()
    %134 = vector.shape_cast %133 : vector<2x1x8xf32> to vector<2x8xf32>
    %135 = arith.addf %134, %15 : vector<2x8xf32>
    %c0_87 = arith.constant 0 : index
    %c0_88 = arith.constant 0 : index
    %136 = vector.load %arg6[%c0_87, %c0_88] : memref<2x8xf32, #tpu.memory_space<vmem>>, vector<2x8xf32>
    tpu.vector_store %arg6[%c0_87, %c0_88], %69 {strides = array<i32>} : memref<2x8xf32, #tpu.memory_space<vmem>>, vector<2x8xf32>,
    %c0_89 = arith.constant 0 : index
    %c0_90 = arith.constant 0 : index
    %137 = vector.load %arg7[%c0_89, %c0_90] : memref<2x8xf32, #tpu.memory_space<vmem>>, vector<2x8xf32>
    tpu.vector_store %arg7[%c0_89, %c0_90], %135 {strides = array<i32>} : memref<2x8xf32, #tpu.memory_space<vmem>>, vector<2x8xf32>,
    return
  }
  func.func @transform_0(%arg0: i32) -> (i32, i32, i32) {
    %c0_i32 = arith.constant 0 : i32
    %c0_i32_0 = arith.constant 0 : i32
    %c0_i32_1 = arith.constant 0 : i32
    return %arg0, %c0_i32, %c0_i32_0 : i32, i32, i32
  }
  func.func @transform_1(%arg0: i32) -> (i32, i32) {
    %c0_i32 = arith.constant 0 : i32
    %c0_i32_0 = arith.constant 0 : i32
    return %arg0, %c0_i32 : i32, i32
  }
  func.func @transform_2(%arg0: i32) -> (i32, i32) {
    %c0_i32 = arith.constant 0 : i32
    %c0_i32_0 = arith.constant 0 : i32
    %c0_i32_1 = arith.constant 0 : i32
    return %c0_i32, %c0_i32_0 : i32, i32
  }
  func.func @transform_3(%arg0: i32) -> (i32, i32) {
    %c0_i32 = arith.constant 0 : i32
    %c0_i32_0 = arith.constant 0 : i32
    %c0_i32_1 = arith.constant 0 : i32
    return %c0_i32, %c0_i32_0 : i32, i32
  }
  func.func @transform_4(%arg0: i32) -> (i32, i32) {
    %c0_i32 = arith.constant 0 : i32
    %c0_i32_0 = arith.constant 0 : i32
    %c0_i32_1 = arith.constant 0 : i32
    return %c0_i32, %c0_i32_0 : i32, i32
  }
  func.func @transform_5(%arg0: i32) -> (i32, i32) {
    %c0_i32 = arith.constant 0 : i32
    %c0_i32_0 = arith.constant 0 : i32
    return %arg0, %c0_i32 : i32, i32
  }
  func.func @transform_6(%arg0: i32) -> (i32, i32) {
    %c0_i32 = arith.constant 0 : i32
    %c0_i32_0 = arith.constant 0 : i32
    return %arg0, %c0_i32 : i32, i32
  }
}

</mosaic_0001>

<bundles_post_ra>
// kernel: tpu_custom_call.1
= control target key start
LH: loop header
LB: loop body
LE: loop exit
PB: predicated region body
PF: predicated region fallthrough
CT: control target
= control target key end

     0   :  { %12 = vsyncpa [#allocation4], 0  ;;  %s2924_s0 = inlined_call_operand.hbm [shape: f32[2,8,32], index: 0, kind: input, shape index: {}]   ;;  %s2925_s1 = inlined_call_operand.hbm [shape: f32[2,8], index: 1, kind: input, shape index: {}]   ;;  %s2926_s2 = inlined_call_operand.hbm [shape: f32[32,32], index: 2, kind: input, shape index: {}]   ;;  %s2927_s3 = inlined_call_operand.hbm [shape: f32[32,32], index: 3, kind: input, shape index: {}]   ;;  %s2928_s4 = inlined_call_operand.vmem [shape: f32[1,32], index: 4, kind: input, shape index: {}]   ;;  %s2929_s5 = inlined_call_operand.hbm [shape: f32[2,8], index: 5, kind: output, shape index: {0}]   ;;  %s2930_s6 = inlined_call_operand.hbm [shape: f32[2,8], index: 6, kind: output, shape index: {1}]  }
   0x1   :  { %13 = vsyncpa [#allocation7], 0 }
   0x2   :  { %14 = vsyncpa [#allocation10], 0 }
   0x3   :  { %15 = vsyncpa [#allocation5], 0 }
   0x4   :  { %16 = vsyncpa [#allocation13], 0  ;;  %s2587_s21 = smov [#allocation6]   ;;  %s2588_s23 = smov [#allocation3]  }
   0x5   :  { %s35_s22 = sshll.u32 %s2587_s21, 4  ;;  %s22_s24 = sshll.u32 %s2588_s23, 4  ;;  %s36_s22 = int_to_ptr.vmem [resolvable:$true] %s35_s22  ;;  %s23_s24 = int_to_ptr.vmem [resolvable:$true] %s22_s24 }
   0x6   :  { %s2465_s25 = scalar_lea.vmem %s36_s22, 32  ;;  %p2470_p1 = scmp.lt.s32.totalorder %s36_s22, %s36_s22 }
   0x7   :  { %p2466_p0 = scmp.ne.s32.totalorder %s36_s22, %s2465_s25  ;;  %p2471_p2 = scmp.lt.s32.totalorder %s2465_s25, %s2465_s25 }
   0x9   :  { %p2472_p3 = por %p2471_p2, %p2470_p1 }
   0xb   :  { %p2473_p4 = pnand %p2472_p3, %p2466_p0 }
   0xd   :  { %2476 = shalt.err (!%p2473_p4)
}
   0xe   :  { %38 = dma.hbm_to_vmem [thread:$0]  %s2925_s1, 32, %s36_s22, [#allocation7]  }
   0xf   :  { %s2485_s28 = scalar_lea.vmem %s23_s24, 256  ;;  %p2490_p6 = scmp.lt.s32.totalorder %s23_s24, %s23_s24 }
  0x10   :  { %p2486_p5 = scmp.ne.s32.totalorder %s23_s24, %s2485_s28  ;;  %p2491_p7 = scmp.lt.s32.totalorder %s2485_s28, %s2485_s28 }
  0x12   :  { %p2492_p8 = por %p2491_p7, %p2490_p6 }
  0x14   :  { %p2493_p9 = pnand %p2492_p8, %p2486_p5 }
  0x16   :  { %2496 = shalt.err (!%p2493_p9)
}
  0x17   :  { %s2589_s29 = smov 128   ;;  %s2590_s30 = smov 8  }
  0x18   :  { %28 = dma.hbm_to_vmem [thread:$0]  %s2924_s0, 256, %s23_s24, [#allocation4], %s2589_s29, %s2589_s29, %s2590_s30  }
  0x19   :  { %s2591_s9 = smov [#allocation8]   ;;  %s2592_s11 = smov [#allocation9]  }
  0x1a   :  { %s44_s10 = sshll.u32 %s2591_s9, 4  ;;  %s56_s12 = sshll.u32 %s2592_s11, 4  ;;  %s45_s10 = int_to_ptr.vmem [resolvable:$true] %s44_s10  ;;  %s57_s12 = int_to_ptr.vmem [resolvable:$true] %s56_s12 }
  0x1b   :  { %s2505_s1 = scalar_lea.vmem %s45_s10, 512  ;;  %p2510_p11 = scmp.lt.s32.totalorder %s45_s10, %s45_s10 }
  0x1c   :  { %p2506_p10 = scmp.ne.s32.totalorder %s45_s10, %s2505_s1  ;;  %p2511_p12 = scmp.lt.s32.totalorder %s2505_s1, %s2505_s1 }
  0x1e   :  { %p2512_p13 = por %p2511_p12, %p2510_p11 }
  0x20   :  { %p2513_p0 = pnand %p2512_p13, %p2506_p10 }
  0x22   :  { %2516 = shalt.err (!%p2513_p0)
}
  0x23   :  { %50 = dma.hbm_to_vmem [thread:$0]  %s2926_s2, 512, %s45_s10, [#allocation7], %s2589_s29, %s2589_s29, %s2590_s30  }
  0x24   :  { %s2525_s15 = scalar_lea.vmem %s57_s12, 512  ;;  %p2530_p2 = scmp.lt.s32.totalorder %s57_s12, %s57_s12 }
  0x25   :  { %p2526_p1 = scmp.ne.s32.totalorder %s57_s12, %s2525_s15  ;;  %p2531_p3 = scmp.lt.s32.totalorder %s2525_s15, %s2525_s15 }
  0x27   :  { %p2532_p4 = por %p2531_p3, %p2530_p2 }
  0x29   :  { %p2533_p5 = pnand %p2532_p4, %p2526_p1 }
  0x2b   :  { %2536 = shalt.err (!%p2533_p5)
}
  0x2c   :  { %62 = dma.hbm_to_vmem [thread:$0]  %s2927_s3, 512, %s57_s12, [#allocation10], %s2589_s29, %s2589_s29, %s2590_s30  }
  0x2d   :  { %2577 = dma.done.wait [#allocation4], 256  }
  0x2e   :  { %2578 = vsyncadd [#allocation4], 4294967040 }
  0x2f   :  { %2579 = dma.done.wait [#allocation7], 544  }
  0x30   :  { %2580 = vsyncadd [#allocation7], 4294966752 }
  0x31   :  { %2581 = dma.done.wait [#allocation10], 512  }
  0x32   :  { %2582 = vsyncadd [#allocation10], 4294966784  ;;  %v2593_v0 = vmov 0.0   ;;  %vm2594_vm0 = vmmov 0   ;;  %vm94_vm1 = vcmask 261120   ;;  %v80_v1 = vld [vmem:[#allocation8 + $0x18] sm:$0xff]  ;;  %v180_v13 = vlaneseq }
  0x33   :  { %2198 = vmatprep.subr.mxu1 %v2593_v0  ;;  %2206 = vmatprep.mubr.msk.f32.mxu1 %vm2594_vm0, %v2593_v0  ;;  %v79_v2 = vld [vmem:[#allocation8 + $0x10] sm:$0xff]  ;;  %v78_v4 = vld [vmem:[#allocation8 + $0x8] sm:$0xff]  ;;  %v2654_v5 = vld [vmem:[#allocation9 + $0x18] sm:$0xff]  ;;  %v2595_v11 = vmov 1983009808   ;;  %vm242_vm2 = vcmask 254976  }
  0x34   :  { %2187 = vmatprep.subr.mxu0 %v80_v1  ;;  %v2650_v3 = vld [vmem:[#allocation3] sm:$0xff]  ;;  %2199 = vmatpush3.msra.mxu1 %v2654_v5  ;;  %v77_v7 = vld [vmem:[#allocation8] sm:$0xff]  ;;  %v2663_v9 = vld [vmem:[#allocation3 + $0x8] sm:$0xff]  ;;  %v178_v12 = vunpack.c.l.s4 %v2595_v11  ;;  %v2696_v15 = vshrl.u32 %v180_v13, 7  ;;  %v2596_v16 = vmov 1934713408  }
  0x35   :  { %2188 = vmatpush3.msra.mxu0 %v80_v1  ;;  %2195 = vmatprep.mubr.msk.f32.mxu0 %vm94_vm1, %v2650_v3  ;;  %v2656_v6 = vld [vmem:[#allocation9 + $0x10] sm:$0xff]  ;;  %v2660_v8 = vld [vmem:[#allocation9 + $0x8] sm:$0xff]  ;;  %v2666_v10 = vld [vmem:[#allocation9] sm:$0xff]  ;;  %v209_v17 = vunpack.c.l.s4 %v2596_v16  ;;  %vm1053_vm3 = vcmask 1041409   ;;  %vm1056_vm4 = vcmask 58368   ;;  %vm1088_vm5 = vcmask 64512  }
  0x36   :  { %2189 = vmatprep.subr.mxu0 %v79_v2  ;;  %2200 = vmatprep.subr.mxu1 %v2593_v0  ;;  %v179_v14 = vunpack.c.0.s8 %v178_v12  ;;  %v2061_v18 = vld [vmem:[%s2928_s4] ss:$0 sm:$0xff]  ;;  %s2598_s4 = smov [#allocation11]  }
  0x37   :  { %2190 = vmatpush3.msra.mxu0 %v79_v2  ;;  %2201 = vmatpush3.msra.mxu1 %v2656_v6  ;;  %v210_v22 = vunpack.c.0.s8 %v209_v17  ;;  %s2036_s17 = sshll.u32 %s2598_s4, 4  ;;  %s2037_s17 = int_to_ptr.vmem [resolvable:$true] %s2036_s17 }
  0x38   :  { %2191 = vmatprep.subr.mxu0 %v78_v4  ;;  %2202 = vmatprep.subr.mxu1 %v2593_v0  ;;  %v182_v21 = vsub.s32 %v179_v14, %v2696_v15  ;;  %s2537_s18 = scalar_lea.vmem %s2037_s17, 32  ;;  %p2542_p7 = scmp.lt.s32.totalorder %s2037_s17, %s2037_s17 }
  0x39   :  { %2192 = vmatpush3.msra.mxu0 %v78_v4  ;;  %2203 = vmatpush3.msra.mxu1 %v2660_v8  ;;  %v213_v31 = vsub.s32 %v210_v22, %v2696_v15  ;;  %p2538_p6 = scmp.ne.s32.totalorder %s2037_s17, %s2537_s18  ;;  %p2543_p8 = scmp.lt.s32.totalorder %s2537_s18, %s2537_s18 }
  0x3a   :  { %2193 = vmatprep.subr.mxu0 %v77_v7  ;;  %2204 = vmatprep.subr.mxu1 %v2593_v0 }
  0x3b   :  { %2194 = vmatpush3.msra.mxu0 %v77_v7  ;;  %2205 = vmatpush3.msra.mxu1 %v2666_v10  ;;  %p2544_p9 = por %p2543_p8, %p2542_p7 }
  0x3c   :  { %2196 = vmatmul.mubr.msk.f32.vlgmr.msra.gmra.mxu0 %vm94_vm1, %v2663_v9  ;;  %2207 = vmatmul.mubr.f32.vlgmr.msra.gmra.mxu1 %v2593_v0 }
  0x3d   :  { %2209 = vmatprep.subr.mxu0 %v2593_v0  ;;  %2217 = vmatprep.mubr.msk.f32.mxu0 %vm2594_vm0, %v2593_v0  ;;  %p2545_p10 = pnand %p2544_p9, %p2538_p6 }
  0x3e   :  { %2210 = vmatpush3.msra.mxu0 %v2654_v5  ;;  %2220 = vmatprep.subr.mxu1 %v2593_v0 }
  0x3f   :  { %2211 = vmatprep.subr.mxu0 %v2593_v0  ;;  %2221 = vmatpush3.msra.mxu1 %v2654_v5 }
  0x40   :  { %2212 = vmatpush3.msra.mxu0 %v2656_v6  ;;  %2222 = vmatprep.subr.mxu1 %v2593_v0 }
  0x41   :  { %2213 = vmatprep.subr.mxu0 %v2593_v0  ;;  %2223 = vmatpush3.msra.mxu1 %v2656_v6 }
  0x42   :  { %2214 = vmatpush3.msra.mxu0 %v2660_v8  ;;  %2224 = vmatprep.subr.mxu1 %v2593_v0 }
  0x43   :  { %2215 = vmatprep.subr.mxu0 %v2593_v0  ;;  %2225 = vmatpush3.msra.mxu1 %v2660_v8 }
  0x44   :  { %2216 = vmatpush3.msra.mxu0 %v2666_v10  ;;  %2226 = vmatprep.subr.mxu1 %v2593_v0 }
  0x45   :  { %2228 = vmatprep.mubr.msk.f32.mxu1 %vm2594_vm0, %v2593_v0  ;;  %2227 = vmatpush3.msra.mxu1 %v2666_v10 }
  0x46   :  { %2231 = vmatprep.subr.mxu0 %v2593_v0  ;;  %2242 = vmatprep.subr.mxu1 %v2593_v0 }
  0xfc   :  { %v2197_v19 = vpop.f32.mrf.mxu0  ;;  %v324_v23 = vpop.f32.mrf.mxu1 }
  0xfd   :  { %v173_v20 = vadd.f32 %v2197_v19, %v2061_v18 }
  0xfe   :  { %v167_v24 = vpop.f32.mrf.mxu0  ;;  %v2208_v27 = vpop.f32.mrf.mxu1 }
  0xff   :  { %v191_v25 = vcombine.high %v173_v20, %v2593_v0  ;;  %v168_v26 = vadd.f32 %v2061_v18, %v167_v24  ;;  %v198_v28 = vrot.slane %v173_v20, %v182_v21  ;;  %v2597_v27 = vmov 1966171168  }
 0x101   :  { %v176_v29 = vcombine.high %v168_v26, %v2593_v0  ;;  %v183_v30 = vrot.slane %v168_v26, %v182_v21  ;;  %v205_v32 = vrot.slane %v191_v25, %v182_v21 }
 0x103   :  { %v190_v33 = vrot.slane %v176_v29, %v182_v21  ;;  %v206_v34 = vcombine.low %v183_v30, %v198_v28  ;;  %v207_v35 = vcombine.high %v183_v30, %v198_v28  ;;  %v871_v28 = vunpack.c.l.s4 %v2597_v27 }
 0x105   :  { %v214_v36 = vrot.slane %v206_v34, %v213_v31  ;;  %v221_v37 = vrot.slane %v207_v35, %v213_v31  ;;  %v222_v38 = vcombine.low %v190_v33, %v205_v32  ;;  %v223_v39 = vcombine.high %v190_v33, %v205_v32 }
 0x106   :  { %v872_v29 = vunpack.c.0.s8 %v871_v28 }
 0x107   :  { %v230_v40 = vrot.slane %v222_v38, %v213_v31  ;;  %v237_v41 = vrot.slane %v223_v39, %v213_v31  ;;  %v238_v42 = vcombine.high %v214_v36, %v2593_v0  ;;  %v239_v43 = vcombine.high %v221_v37, %v2593_v0  ;;  %243 = vst.msk [vmem:[#allocation2] sm:$0x3] %vm242_vm2, %v214_v36 }
 0x108   :  { %245 = vst.msk [vmem:[#allocation2 + $0x4] sm:$0x3] %vm242_vm2, %v221_v37  ;;  %v2784_v30 = vsub.s32 %v872_v29, %v2696_v15  ;;  %v251_v15 = vld [vmem:[#allocation6] sm:$0x3] }
 0x109   :  { %v240_v44 = vcombine.high %v230_v40, %v2593_v0  ;;  %v241_v45 = vcombine.high %v237_v41, %v2593_v0  ;;  %244 = vst.msk [vmem:[#allocation2 + $0x2] sm:$0x3] %vm242_vm2, %v238_v42  ;;  %246 = vst.msk [vmem:[#allocation2 + $0x6] sm:$0x3] %vm242_vm2, %v239_v43  ;;  %v252_v36 = vsub.f32 1.0, %v251_v15 }
 0x10a   :  { %247 = vst.msk [vmem:[#allocation2 + $0x8] sm:$0x3] %vm242_vm2, %v230_v40  ;;  %249 = vst.msk [vmem:[#allocation2 + $0xc] sm:$0x3] %vm242_vm2, %v237_v41 }
 0x10b   :  { %248 = vst.msk [vmem:[#allocation2 + $0xa] sm:$0x3] %vm242_vm2, %v240_v44  ;;  %250 = vst.msk [vmem:[#allocation2 + $0xe] sm:$0x3] %vm242_vm2, %v241_v45  ;;  %v2800_v37 = vmul.f32 -1e+30, %v252_v36 }
 0x10d   :  { %v1045_v39 = vrot.slane %v2800_v37, 1 }
 0x10e   :  { %v254_v46 = vld [vmem:[#allocation2] sm:$0x3] }
 0x10f   :  { %v328_v47 = vadd.f32 %v324_v23, %v254_v46  ;;  %v408_v54 = vld [vmem:[#allocation2 + $0x4] sm:$0x3] }
 0x110   :  { %v331_v49 = vld [vmem:[#allocation2 + $0x2] sm:$0x3]  ;;  %v485_v59 = vld [vmem:[#allocation2 + $0x6] sm:$0x3] }
 0x111   :  { %2417 = vtanh.f32 %v328_v47  ;;  %v562_v1 = vld [vmem:[#allocation2 + $0x8] sm:$0x3]  ;;  %v716_v18 = vld [vmem:[#allocation2 + $0xc] sm:$0x3] }
 0x112   :  { %v639_v12 = vld [vmem:[#allocation2 + $0xa] sm:$0x3]  ;;  %v793_v23 = vld [vmem:[#allocation2 + $0xe] sm:$0x3]  ;;  %v1542_v15 = vld [vmem:[#allocation2 + $0x8] sm:$0x3] }
 0x11e   :  { %v2418_v48 = vpop.eup %2417 }
 0x11f   :  { %2218 = vmatmul.mubr.msk.f32.vlgmr.msra.gmra.mxu0 %vm94_vm1, %v2418_v48 }
 0x120   :  { %2232 = vmatpush3.msra.mxu0 %v2654_v5  ;;  %2239 = vmatprep.mubr.msk.f32.mxu0 %vm2594_vm0, %v2593_v0 }
 0x121   :  { %2233 = vmatprep.subr.mxu0 %v2593_v0 }
 0x122   :  { %2234 = vmatpush3.msra.mxu0 %v2656_v6 }
 0x123   :  { %2235 = vmatprep.subr.mxu0 %v2593_v0 }
 0x124   :  { %2236 = vmatpush3.msra.mxu0 %v2660_v8 }
 0x125   :  { %2237 = vmatprep.subr.mxu0 %v2593_v0 }
 0x126   :  { %2238 = vmatpush3.msra.mxu0 %v2666_v10 }
 0x127   :  { %2253 = vmatprep.subr.mxu0 %v2593_v0 }
 0x1df   :  { %v401_v50 = vpop.f32.mrf.mxu0 }
 0x1e0   :  { %v405_v51 = vadd.f32 %v401_v50, %v331_v49 }
 0x1e1   :  { %v2219_v52 = vpop.f32.mrf.mxu0 }
 0x1e2   :  { %2419 = vtanh.f32 %v405_v51 }
 0x1ef   :  { %v2420_v53 = vpop.eup %2419 }
 0x1f0   :  { %2229 = vmatmul.mubr.msk.f32.vlgmr.msra.gmra.mxu1 %vm94_vm1, %v2420_v53 }
 0x1f1   :  { %2243 = vmatpush3.msra.mxu1 %v2654_v5  ;;  %2250 = vmatprep.mubr.msk.f32.mxu1 %vm2594_vm0, %v2593_v0 }
 0x1f2   :  { %2244 = vmatprep.subr.mxu1 %v2593_v0 }
 0x1f3   :  { %2245 = vmatpush3.msra.mxu1 %v2656_v6 }
 0x1f4   :  { %2246 = vmatprep.subr.mxu1 %v2593_v0 }
 0x1f5   :  { %2247 = vmatpush3.msra.mxu1 %v2660_v8 }
 0x1f6   :  { %2248 = vmatprep.subr.mxu1 %v2593_v0 }
 0x1f7   :  { %2249 = vmatpush3.msra.mxu1 %v2666_v10 }
 0x1f8   :  { %2264 = vmatprep.subr.mxu1 %v2593_v0 }
 0x2b0   :  { %v478_v55 = vpop.f32.mrf.mxu1 }
 0x2b1   :  { %v482_v56 = vadd.f32 %v478_v55, %v408_v54 }
 0x2b2   :  { %v2230_v57 = vpop.f32.mrf.mxu1 }
 0x2b3   :  { %2421 = vtanh.f32 %v482_v56 }
 0x2c0   :  { %v2422_v58 = vpop.eup %2421 }
 0x2c1   :  { %2240 = vmatmul.mubr.msk.f32.vlgmr.msra.gmra.mxu0 %vm94_vm1, %v2422_v58 }
 0x2c2   :  { %2254 = vmatpush3.msra.mxu0 %v2654_v5  ;;  %2261 = vmatprep.mubr.msk.f32.mxu0 %vm2594_vm0, %v2593_v0 }
 0x2c3   :  { %2255 = vmatprep.subr.mxu0 %v2593_v0 }
 0x2c4   :  { %2256 = vmatpush3.msra.mxu0 %v2656_v6 }
 0x2c5   :  { %2257 = vmatprep.subr.mxu0 %v2593_v0 }
 0x2c6   :  { %2258 = vmatpush3.msra.mxu0 %v2660_v8 }
 0x2c7   :  { %2259 = vmatprep.subr.mxu0 %v2593_v0 }
 0x2c8   :  { %2260 = vmatpush3.msra.mxu0 %v2666_v10 }
 0x2c9   :  { %2275 = vmatprep.subr.mxu0 %v2593_v0 }
 0x381   :  { %v555_v60 = vpop.f32.mrf.mxu0 }
 0x382   :  { %v559_v61 = vadd.f32 %v555_v60, %v485_v59 }
 0x383   :  { %v2241_v62 = vpop.f32.mrf.mxu0 }
 0x384   :  { %2423 = vtanh.f32 %v559_v61 }
 0x391   :  { %v2424_v63 = vpop.eup %2423 }
 0x392   :  { %2251 = vmatmul.mubr.msk.f32.vlgmr.msra.gmra.mxu1 %vm94_vm1, %v2424_v63 }
 0x393   :  { %2265 = vmatpush3.msra.mxu1 %v2654_v5  ;;  %2272 = vmatprep.mubr.msk.f32.mxu1 %vm2594_vm0, %v2593_v0 }
 0x394   :  { %2266 = vmatprep.subr.mxu1 %v2593_v0 }
 0x395   :  { %2267 = vmatpush3.msra.mxu1 %v2656_v6 }
 0x396   :  { %2268 = vmatprep.subr.mxu1 %v2593_v0 }
 0x397   :  { %2269 = vmatpush3.msra.mxu1 %v2660_v8 }
 0x398   :  { %2270 = vmatprep.subr.mxu1 %v2593_v0 }
 0x399   :  { %2271 = vmatpush3.msra.mxu1 %v2666_v10 }
 0x39a   :  { %2286 = vmatprep.subr.mxu1 %v2593_v0 }
 0x452   :  { %v632_v2 = vpop.f32.mrf.mxu1 }
 0x453   :  { %v636_v4 = vadd.f32 %v632_v2, %v562_v1 }
 0x454   :  { %v2252_v7 = vpop.f32.mrf.mxu1 }
 0x455   :  { %2425 = vtanh.f32 %v636_v4 }
 0x462   :  { %v2426_v11 = vpop.eup %2425 }
 0x463   :  { %2262 = vmatmul.mubr.msk.f32.vlgmr.msra.gmra.mxu0 %vm94_vm1, %v2426_v11 }
 0x464   :  { %2276 = vmatpush3.msra.mxu0 %v2654_v5  ;;  %2283 = vmatprep.mubr.msk.f32.mxu0 %vm2594_vm0, %v2593_v0 }
 0x465   :  { %2277 = vmatprep.subr.mxu0 %v2593_v0 }
 0x466   :  { %2278 = vmatpush3.msra.mxu0 %v2656_v6 }
 0x467   :  { %2279 = vmatprep.subr.mxu0 %v2593_v0 }
 0x468   :  { %2280 = vmatpush3.msra.mxu0 %v2660_v8 }
 0x469   :  { %2281 = vmatprep.subr.mxu0 %v2593_v0 }
 0x46a   :  { %2282 = vmatpush3.msra.mxu0 %v2666_v10 }
 0x46b   :  { %2296 = vmatprep.subr.mxu0 %v2593_v0 }
 0x523   :  { %v709_v13 = vpop.f32.mrf.mxu0 }
 0x524   :  { %v713_v14 = vadd.f32 %v709_v13, %v639_v12 }
 0x525   :  { %v2263_v16 = vpop.f32.mrf.mxu0 }
 0x526   :  { %2427 = vtanh.f32 %v713_v14  ;;  %v1235_v14 = vld [vmem:[#allocation2] sm:$0x3] }
 0x533   :  { %v2428_v17 = vpop.eup %2427 }
 0x534   :  { %2273 = vmatmul.mubr.msk.f32.vlgmr.msra.gmra.mxu1 %vm94_vm1, %v2428_v17 }
 0x535   :  { %2287 = vmatpush3.xpose.msk.msra.mxu1 %vm94_vm1, %v2650_v3  ;;  %2288 = vmatprep.mubr.msk.f32.mxu1 %vm2594_vm0, %v2593_v0 }
 0x536   :  { %2291 = vmatprep.subr.mxu1 %v2593_v0 }
 0x5f4   :  { %v786_v19 = vpop.f32.mrf.mxu1 }
 0x5f5   :  { %v790_v20 = vadd.f32 %v786_v19, %v716_v18 }
 0x5f6   :  { %v2274_v21 = vpop.f32.mrf.mxu1 }
 0x5f7   :  { %2429 = vtanh.f32 %v790_v20  ;;  %v1314_v20 = vld [vmem:[#allocation2 + $0x2] sm:$0x3] }
 0x604   :  { %v2430_v22 = vpop.eup %2429 }
 0x605   :  { %2284 = vmatmul.mubr.msk.f32.vlgmr.msra.gmra.mxu0 %vm94_vm1, %v2430_v22 }
 0x606   :  { %2297 = vmatpush3.msra.mxu0 %v2650_v3  ;;  %2298 = vmatprep.mubr.msk.f32.mxu0 %vm2594_vm0, %v2593_v0 }
 0x607   :  { %2306 = vmatprep.subr.mxu0 %v2593_v0 }
 0x6c5   :  { %v863_v24 = vpop.f32.mrf.mxu0 }
 0x6c6   :  { %v867_v25 = vadd.f32 %v863_v24, %v793_v23 }
 0x6c7   :  { %v2285_v26 = vpop.f32.mrf.mxu0 }
 0x6c8   :  { %2431 = vtanh.f32 %v867_v25  ;;  %v1390_v25 = vld [vmem:[#allocation2 + $0x4] sm:$0x3] }
 0x6d5   :  { %v2432_v31 = vpop.eup %2431 }
 0x6d6   :  { %v876_v32 = vrot.slane %v2432_v31, %v2784_v30  ;;  %v1466_v31 = vld [vmem:[#allocation2 + $0x6] sm:$0x3] }
 0x6d8   :  { %v884_v33 = vrot.slane %v876_v32, %v2784_v30  ;;  %v877_v34 = vcombine.high %v876_v32, %v876_v32 }
 0x6da   :  { %2289 = vmatmul.mubr.msk.f32.vlgmr.msra.gmra.mxu1 %vm94_vm1, %v884_v33  ;;  %v891_v35 = vrot.slane %v877_v34, %v2784_v30 }
 0x6db   :  { %2292 = vmatpush3.xpose.msk.msra.mxu1 %vm94_vm1, %v2663_v9  ;;  %2293 = vmatprep.mubr.msk.f32.mxu1 %vm2594_vm0, %v2593_v0 }
 0x6dc   :  { %2301 = vmatprep.subr.mxu1 %v2593_v0 }
 0x6de   :  { %2294 = vmatmul.mubr.msk.f32.vlgmr.msra.gmra.mxu1 %vm94_vm1, %v891_v35 }
 0x6df   :  { %2302 = vmatpush3.msra.mxu1 %v2663_v9  ;;  %2303 = vmatprep.mubr.msk.f32.mxu1 %vm2594_vm0, %v2593_v0 }
 0x6e0   :  { %2317 = vmatprep.subr.mxu1 %v2593_v0 }
 0x79a   :  { %v965_v38 = vpop.f32.mrf.mxu1 }
 0x79b   :  { %v1048_v44 = vadd.f32 %v965_v38, %v2800_v37 }
 0x79c   :  { %v2290_v40 = vpop.f32.mrf.mxu1 }
 0x79e   :  { %v1040_v41 = vpop.f32.mrf.mxu1 }
 0x79f   :  { %v1049_v42 = vadd.f32 %v1045_v39, %v1040_v41 }
 0x7a0   :  { %v2295_v43 = vpop.f32.mrf.mxu1 }
 0x7a1   :  { %v1052_v45 = vrot.slane %v1049_v42, 7 }
 0x7a3   :  { %v1054_v46 = vsel %vm1053_vm3, %v1052_v45, %v1048_v44 }
 0x7a4   :  { %v1057_v47 = vsel %vm1056_vm4, %v1054_v46, -inf  ;;  %2023 = vst.msk [vmem:[#allocation11] sm:$0x3] %vm1056_vm4, %v1054_v46 }
 0x7a5   :  { %1058 = vmax.xlane.f32.xlu0 %v1057_v47 }
 0x82e   :  { %v1059_v48 = vpop.xlane.xlu0 %1058 }
 0x82f   :  { %v1061_v49 = vrot.slane %v1059_v48, 1  ;;  %v1064_v50 = vsub.f32 %v1048_v44, %v1059_v48  ;;  %v1770_v48 = vld [vmem:[#allocation2 + $0xe] sm:$0x3] }
 0x831   :  { %v1065_v51 = vsub.f32 %v1049_v42, %v1061_v49  ;;  %v1066_v52 = vmul.f32 1.442695, %v1064_v50  ;;  %v1618_v42 = vld [vmem:[#allocation2 + $0xa] sm:$0x3] }
 0x833   :  { %v1068_v53 = vmul.f32 1.442695, %v1065_v51 }
 0x835   :  { %2433 = vpow2.f32 %v1068_v53 }
 0x836   :  { %2435 = vpow2.f32 %v1066_v52 }
 0x842   :  { %v2434_v54 = vpop.eup %2433 }
 0x843   :  { %v1072_v55 = vrot.slane %v2434_v54, 7  ;;  %v2436_v56 = vpop.eup %2435 }
 0x845   :  { %v1073_v57 = vsel %vm1053_vm3, %v1072_v55, %v2436_v56 }
 0x846   :  { %v1075_v58 = vsel %vm1056_vm4, %v1073_v57, 0.0 }
 0x847   :  { %1076 = vadd.xlane.f32.xlu0 %v1075_v58 }
 0x8d0   :  { %v1077_v59 = vpop.xlane.xlu0 %1076 }
 0x8d1   :  { %v1079_v60 = vrot.slane %v1077_v59, 1  ;;  %2437 = vrcp.f32 %v1077_v59 }
 0x8d3   :  { %2439 = vrcp.f32 %v1079_v60 }
 0x8de   :  { %v2438_v61 = vpop.eup %2437 }
 0x8df   :  { %v1083_v62 = vmul.f32 %v2438_v61, %v2436_v56 }
 0x8e0   :  { %v2440_v63 = vpop.eup %2439 }
 0x8e1   :  { %2299 = vmatmul.mubr.msk.f32.vlgmr.msra.gmra.mxu0 %vm1088_vm5, %v1083_v62  ;;  %v1085_v1 = vmul.f32 %v2440_v63, %v2434_v54 }
 0x8e2   :  { %2307 = vmatpush3.msra.mxu0 %v2654_v5  ;;  %2314 = vmatprep.mubr.msk.f32.mxu0 %vm2594_vm0, %v2593_v0 }
 0x8e3   :  { %2304 = vmatmul.mubr.msk.f32.vlgmr.msra.gmra.mxu1 %vm1088_vm5, %v1085_v1  ;;  %2308 = vmatprep.subr.mxu0 %v2593_v0 }
 0x8e4   :  { %2309 = vmatpush3.msra.mxu0 %v2656_v6  ;;  %2318 = vmatpush3.msra.mxu1 %v2654_v5 }
 0x8e5   :  { %2310 = vmatprep.subr.mxu0 %v2593_v0  ;;  %2319 = vmatprep.subr.mxu1 %v2593_v0 }
 0x8e6   :  { %2311 = vmatpush3.msra.mxu0 %v2660_v8  ;;  %2320 = vmatpush3.msra.mxu1 %v2656_v6 }
 0x8e7   :  { %2312 = vmatprep.subr.mxu0 %v2593_v0  ;;  %2321 = vmatprep.subr.mxu1 %v2593_v0 }
 0x8e8   :  { %2313 = vmatpush3.msra.mxu0 %v2666_v10  ;;  %2322 = vmatpush3.msra.mxu1 %v2660_v8 }
 0x8e9   :  { %2323 = vmatprep.subr.mxu1 %v2593_v0  ;;  %2325 = vmatprep.mubr.msk.f32.mxu1 %vm2594_vm0, %v2593_v0 }
 0x8ea   :  { %2324 = vmatpush3.msra.mxu1 %v2666_v10  ;;  %2328 = vmatprep.subr.mxu0 %v2593_v0 }
 0x8eb   :  { %2339 = vmatprep.subr.mxu1 %v2593_v0 }
 0x9a1   :  { %v1158_v2 = vpop.f32.mrf.mxu0 }
 0x9a3   :  { %v2300_v4 = vpop.f32.mrf.mxu0  ;;  %v1231_v7 = vpop.f32.mrf.mxu1 }
 0x9a4   :  { %v1238_v11 = vrot.slane %v1231_v7, 7 }
 0x9a5   :  { %v2305_v12 = vpop.f32.mrf.mxu1 }
 0x9a6   :  { %v1239_v13 = vsel %vm1053_vm3, %v1238_v11, %v1158_v2 }
 0x9a7   :  { %2315 = vmatmul.mubr.msk.f32.vlgmr.msra.gmra.mxu0 %vm94_vm1, %v1239_v13 }
 0x9a8   :  { %2329 = vmatpush3.msra.mxu0 %v2654_v5  ;;  %2336 = vmatprep.mubr.msk.f32.mxu0 %vm2594_vm0, %v2593_v0 }
 0x9a9   :  { %2330 = vmatprep.subr.mxu0 %v2593_v0 }
 0x9aa   :  { %2331 = vmatpush3.msra.mxu0 %v2656_v6 }
 0x9ab   :  { %2332 = vmatprep.subr.mxu0 %v2593_v0 }
 0x9ac   :  { %2333 = vmatpush3.msra.mxu0 %v2660_v8 }
 0x9ad   :  { %2334 = vmatprep.subr.mxu0 %v2593_v0 }
 0x9ae   :  { %2335 = vmatpush3.msra.mxu0 %v2666_v10 }
 0x9af   :  { %2350 = vmatprep.subr.mxu0 %v2593_v0 }
 0xa67   :  { %v1308_v16 = vpop.f32.mrf.mxu0 }
 0xa68   :  { %v1312_v17 = vadd.f32 %v1308_v16, %v1235_v14 }
 0xa69   :  { %v2316_v18 = vpop.f32.mrf.mxu0 }
 0xa6a   :  { %2441 = vtanh.f32 %v1312_v17 }
 0xa77   :  { %v2442_v19 = vpop.eup %2441 }
 0xa78   :  { %2326 = vmatmul.mubr.msk.f32.vlgmr.msra.gmra.mxu1 %vm94_vm1, %v2442_v19 }
 0xa79   :  { %2340 = vmatpush3.msra.mxu1 %v2654_v5  ;;  %2347 = vmatprep.mubr.msk.f32.mxu1 %vm2594_vm0, %v2593_v0 }
 0xa7a   :  { %2341 = vmatprep.subr.mxu1 %v2593_v0 }
 0xa7b   :  { %2342 = vmatpush3.msra.mxu1 %v2656_v6 }
 0xa7c   :  { %2343 = vmatprep.subr.mxu1 %v2593_v0 }
 0xa7d   :  { %2344 = vmatpush3.msra.mxu1 %v2660_v8 }
 0xa7e   :  { %2345 = vmatprep.subr.mxu1 %v2593_v0 }
 0xa7f   :  { %2346 = vmatpush3.msra.mxu1 %v2666_v10 }
 0xa80   :  { %2361 = vmatprep.subr.mxu1 %v2593_v0 }
 0xb38   :  { %v1384_v21 = vpop.f32.mrf.mxu1 }
 0xb39   :  { %v1388_v22 = vadd.f32 %v1384_v21, %v1314_v20 }
 0xb3a   :  { %v2327_v23 = vpop.f32.mrf.mxu1 }
 0xb3b   :  { %2443 = vtanh.f32 %v1388_v22 }
 0xb48   :  { %v2444_v24 = vpop.eup %2443 }
 0xb49   :  { %2337 = vmatmul.mubr.msk.f32.vlgmr.msra.gmra.mxu0 %vm94_vm1, %v2444_v24 }
 0xb4a   :  { %2351 = vmatpush3.msra.mxu0 %v2654_v5  ;;  %2358 = vmatprep.mubr.msk.f32.mxu0 %vm2594_vm0, %v2593_v0 }
 0xb4b   :  { %2352 = vmatprep.subr.mxu0 %v2593_v0 }
 0xb4c   :  { %2353 = vmatpush3.msra.mxu0 %v2656_v6 }
 0xb4d   :  { %2354 = vmatprep.subr.mxu0 %v2593_v0 }
 0xb4e   :  { %2355 = vmatpush3.msra.mxu0 %v2660_v8 }
 0xb4f   :  { %2356 = vmatprep.subr.mxu0 %v2593_v0 }
 0xb50   :  { %2357 = vmatpush3.msra.mxu0 %v2666_v10 }
 0xb51   :  { %2372 = vmatprep.subr.mxu0 %v2593_v0 }
 0xc09   :  { %v1460_v26 = vpop.f32.mrf.mxu0 }
 0xc0a   :  { %v1464_v27 = vadd.f32 %v1460_v26, %v1390_v25 }
 0xc0b   :  { %v2338_v28 = vpop.f32.mrf.mxu0 }
 0xc0c   :  { %2445 = vtanh.f32 %v1464_v27 }
 0xc19   :  { %v2446_v29 = vpop.eup %2445 }
 0xc1a   :  { %2348 = vmatmul.mubr.msk.f32.vlgmr.msra.gmra.mxu1 %vm94_vm1, %v2446_v29 }
 0xc1b   :  { %2362 = vmatpush3.msra.mxu1 %v2654_v5  ;;  %2369 = vmatprep.mubr.msk.f32.mxu1 %vm2594_vm0, %v2593_v0 }
 0xc1c   :  { %2363 = vmatprep.subr.mxu1 %v2593_v0 }
 0xc1d   :  { %2364 = vmatpush3.msra.mxu1 %v2656_v6 }
 0xc1e   :  { %2365 = vmatprep.subr.mxu1 %v2593_v0 }
 0xc1f   :  { %2366 = vmatpush3.msra.mxu1 %v2660_v8 }
 0xc20   :  { %2367 = vmatprep.subr.mxu1 %v2593_v0 }
 0xc21   :  { %2368 = vmatpush3.msra.mxu1 %v2666_v10 }
 0xc22   :  { %2383 = vmatprep.subr.mxu1 %v2593_v0 }
 0xcda   :  { %v1536_v32 = vpop.f32.mrf.mxu1 }
 0xcdb   :  { %v1540_v33 = vadd.f32 %v1536_v32, %v1466_v31 }
 0xcdc   :  { %v2349_v34 = vpop.f32.mrf.mxu1 }
 0xcdd   :  { %2447 = vtanh.f32 %v1540_v33 }
 0xcea   :  { %v2448_v35 = vpop.eup %2447 }
 0xceb   :  { %2359 = vmatmul.mubr.msk.f32.vlgmr.msra.gmra.mxu0 %vm94_vm1, %v2448_v35 }
 0xcec   :  { %2373 = vmatpush3.msra.mxu0 %v2654_v5  ;;  %2380 = vmatprep.mubr.msk.f32.mxu0 %vm2594_vm0, %v2593_v0 }
 0xced   :  { %2374 = vmatprep.subr.mxu0 %v2593_v0 }
 0xcee   :  { %2375 = vmatpush3.msra.mxu0 %v2656_v6 }
 0xcef   :  { %2376 = vmatprep.subr.mxu0 %v2593_v0 }
 0xcf0   :  { %2377 = vmatpush3.msra.mxu0 %v2660_v8 }
 0xcf1   :  { %2378 = vmatprep.subr.mxu0 %v2593_v0 }
 0xcf2   :  { %2379 = vmatpush3.msra.mxu0 %v2666_v10 }
 0xcf3   :  { %2394 = vmatprep.subr.mxu0 %v2593_v0 }
 0xdab   :  { %v1612_v36 = vpop.f32.mrf.mxu0 }
 0xdac   :  { %v1616_v38 = vadd.f32 %v1612_v36, %v1542_v15 }
 0xdad   :  { %v2360_v40 = vpop.f32.mrf.mxu0 }
 0xdae   :  { %2449 = vtanh.f32 %v1616_v38 }
 0xdbb   :  { %v2450_v41 = vpop.eup %2449 }
 0xdbc   :  { %2370 = vmatmul.mubr.msk.f32.vlgmr.msra.gmra.mxu1 %vm94_vm1, %v2450_v41 }
 0xdbd   :  { %2384 = vmatpush3.msra.mxu1 %v2654_v5  ;;  %2391 = vmatprep.mubr.msk.f32.mxu1 %vm2594_vm0, %v2593_v0 }
 0xdbe   :  { %2385 = vmatprep.subr.mxu1 %v2593_v0 }
 0xdbf   :  { %2386 = vmatpush3.msra.mxu1 %v2656_v6  ;;  %v1694_v6 = vld [vmem:[#allocation2 + $0xc] sm:$0x3] }
 0xdc0   :  { %2387 = vmatprep.subr.mxu1 %v2593_v0 }
 0xdc1   :  { %2388 = vmatpush3.msra.mxu1 %v2660_v8 }
 0xdc2   :  { %2389 = vmatprep.subr.mxu1 %v2593_v0 }
 0xdc3   :  { %2390 = vmatpush3.msra.mxu1 %v2666_v10 }
 0xdc4   :  { %2399 = vmatprep.subr.mxu1 %v2593_v0 }
 0xe7c   :  { %v1688_v43 = vpop.f32.mrf.mxu1 }
 0xe7d   :  { %v1692_v5 = vadd.f32 %v1688_v43, %v1618_v42 }
 0xe7e   :  { %v2371_v44 = vpop.f32.mrf.mxu1 }
 0xe7f   :  { %2451 = vtanh.f32 %v1692_v5 }
 0xe8c   :  { %v2452_v45 = vpop.eup %2451 }
 0xe8d   :  { %2381 = vmatmul.mubr.msk.f32.vlgmr.msra.gmra.mxu0 %vm94_vm1, %v2452_v45 }
 0xe8e   :  { %2395 = vmatpush3.xpose.msk.msra.mxu0 %vm94_vm1, %v2650_v3  ;;  %2396 = vmatprep.mubr.msk.f32.mxu0 %vm2594_vm0, %v2593_v0 }
 0xf4d   :  { %v1764_v8 = vpop.f32.mrf.mxu0 }
 0xf4e   :  { %v1768_v46 = vadd.f32 %v1764_v8, %v1694_v6 }
 0xf4f   :  { %v2382_v10 = vpop.f32.mrf.mxu0 }
 0xf50   :  { %2453 = vtanh.f32 %v1768_v46 }
 0xf5d   :  { %v2454_v47 = vpop.eup %2453 }
 0xf5e   :  { %2392 = vmatmul.mubr.msk.f32.vlgmr.msra.gmra.mxu1 %vm94_vm1, %v2454_v47 }
 0xf5f   :  { %2400 = vmatpush3.xpose.msk.msra.mxu1 %vm94_vm1, %v2663_v9  ;;  %2401 = vmatprep.mubr.msk.f32.mxu1 %vm2594_vm0, %v2593_v0 }
0x101e   :  { %v1840_v49 = vpop.f32.mrf.mxu1 }
0x101f   :  { %v1844_v3 = vadd.f32 %v1840_v49, %v1770_v48 }
0x1020   :  { %v2393_v50 = vpop.f32.mrf.mxu1 }
0x1021   :  { %2455 = vtanh.f32 %v1844_v3 }
0x102e   :  { %v2456_v51 = vpop.eup %2455 }
0x102f   :  { %v1853_v52 = vrot.slane %v2456_v51, %v2784_v30 }
0x1031   :  { %v1861_v53 = vrot.slane %v1853_v52, %v2784_v30  ;;  %v1854_v54 = vcombine.high %v1853_v52, %v1853_v52 }
0x1033   :  { %2397 = vmatmul.mubr.msk.f32.vlgmr.msra.gmra.mxu0 %vm94_vm1, %v1861_v53  ;;  %v1868_v55 = vrot.slane %v1854_v54, %v2784_v30 }
0x1035   :  { %2402 = vmatmul.mubr.msk.f32.vlgmr.msra.gmra.mxu1 %vm94_vm1, %v1868_v55 }
0x1036   :  { %2548 = shalt.err (!%p2545_p10)
}
0x1037   :  { %2039 = dma.vmem_to_hbm [thread:$0]  %s2037_s17, 32, %s2929_s5, [#allocation5]  }
0x1038   :  { %s2599_s21 = smov [#allocation12]  }
0x1039   :  { %s2046_s22 = sshll.u32 %s2599_s21, 4  ;;  %s2047_s22 = int_to_ptr.vmem [resolvable:$true] %s2046_s22 }
0x103a   :  { %s2557_s23 = scalar_lea.vmem %s2047_s22, 32  ;;  %p2562_p12 = scmp.lt.s32.totalorder %s2047_s22, %s2047_s22 }
0x103b   :  { %p2558_p11 = scmp.ne.s32.totalorder %s2047_s22, %s2557_s23  ;;  %p2563_p13 = scmp.lt.s32.totalorder %s2557_s23, %s2557_s23 }
0x103d   :  { %p2564_p0 = por %p2563_p13, %p2562_p12 }
0x103f   :  { %p2565_p1 = pnand %p2564_p0, %p2558_p11 }
0x10f3   :  { %v1942_v0 = vpop.f32.mrf.mxu0 }
0x10f4   :  { %v2021_v58 = vadd.f32 %v1942_v0, %v2800_v37 }
0x10f5   :  { %v2398_v9 = vpop.f32.mrf.mxu0  ;;  %v2017_v56 = vpop.f32.mrf.mxu1 }
0x10f6   :  { %v2022_v30 = vadd.f32 %v2017_v56, %v1045_v39 }
0x10f7   :  { %v2403_v57 = vpop.f32.mrf.mxu1 }
0x10f8   :  { %v2026_v59 = vrot.slane %v2022_v30, 7 }
0x10fa   :  { %v2027_v60 = vsel %vm1053_vm3, %v2026_v59, %v2021_v58 }
0x10fb   :  { %2029 = vst.msk [vmem:[#allocation12] sm:$0x3] %vm1056_vm4, %v2027_v60 }
0x10fc   :  { %2568 = shalt.err (!%p2565_p1)
}
0x10fd   :  { %2049 = dma.vmem_to_hbm [thread:$0]  %s2047_s22, 32, %s2930_s6, [#allocation13]  }
0x10fe   :  { %2583 = dma.done.wait [#allocation5], 32  }
0x10ff   :  { %2584 = vsyncadd [#allocation5], 4294967264 }
0x1100   :  { %2585 = dma.done.wait [#allocation13], 32  }
0x1101   :  { %2586 = vsyncadd [#allocation13], 4294967264 }
0x1102   :  { %2056 = vsyncpa [#allocation4], 1 }
0x1103   :  { %2057 = vsyncpa [#allocation7], 1 }
0x1104   :  { %2058 = vsyncpa [#allocation10], 1 }
0x1105   :  { %2059 = vsyncpa [#allocation5], 1 }
0x1106   :  { %2060 = vsyncpa [#allocation13], 1 }

</bundles_post_ra>
